<compile_context>
chip_gen: v7x
topology: tpu7x:2x2x1
jax: 0.10.0
libtpu: 0.0.40
codegen_flags: <defaults>
</compile_context>

<pallas_src>
import functools

import jax
import jax.numpy as jnp
from jax.experimental import pallas as pl
from jax.experimental.pallas import tpu as pltpu

_NEG_FILL = -1e30  # bias for padded output lanes -> exp() underflows to exactly 0


def _round_up(n, m):
    return ((n + m - 1) // m) * m


def _pad2d(x, rows, cols):
    return jnp.pad(x, ((0, rows - x.shape[0]), (0, cols - x.shape[1])))


def _policy_mlp_kernel(x_ref, w1_ref, w2_ref, w3_ref, b_ref, out_ref, *,
                       h1p, h2p, outp, out_dim):
    """Fused per-batch-tile MLP: relu(x@W1+b1) -> relu(.@W2+b2) -> softmax(.@W3+b3)."""
    wdt = w1_ref.dtype  # bf16 (or f32); MXU operand dtype
    x = x_ref[...]

    # Layer 1: [TB, in] @ [in, h1p] -> f32 accum, bias + ReLU in f32 on VPU.
    h1 = jnp.dot(x.astype(wdt), w1_ref[...], preferred_element_type=jnp.float32)
    h1 = jnp.maximum(h1 + b_ref[0:1, :h1p], 0.0)

    # Layer 2.
    h2 = jnp.dot(h1.astype(wdt), w2_ref[...], preferred_element_type=jnp.float32)
    h2 = jnp.maximum(h2 + b_ref[1:2, :h2p], 0.0)

    # Output layer (lane-padded to `outp`; padded lanes biased to -1e30).
    logits = jnp.dot(h2.astype(wdt), w3_ref[...], preferred_element_type=jnp.float32)
    logits = logits + b_ref[2:3, :outp]

    # Numerically-stable softmax along the lane axis; exact (tb,1) reciprocal.
    m = jnp.max(logits, axis=-1, keepdims=True)
    e = jnp.exp(logits - m)
    denom = jnp.sum(e, axis=-1, keepdims=True)
    inv = 1.0 / denom                       # exact: rows sum to 1 to f32 rounding
    # Store only the real out_dim columns (padded lanes are exact zeros anyway).
    out_ref[...] = (e[:, :out_dim] * inv).astype(out_ref.dtype)


def prepare_params(params, weight_dtype=jnp.bfloat16, lane=128):
    """Pad weights to 128-lane multiples (cast to `weight_dtype`) and pack biases.

    params: list of (W [fan_in, fan_out], b [1, fan_out]) for the 3 layers.
    Returns (packed_arrays, dims) where dims are static ints for the kernel.
    """
    (w1, b1), (w2, b2), (w3, b3) = params
    in_dim, h1 = w1.shape
    h2 = w2.shape[1]
    out_dim = w3.shape[1]
    h1p, h2p, outp = (_round_up(d, lane) for d in (h1, h2, out_dim))
    width = max(h1p, h2p, outp)

    w1p = _pad2d(w1, in_dim, h1p).astype(weight_dtype)
    w2p = _pad2d(w2, h1p, h2p).astype(weight_dtype)      # padded rows are zero
    w3p = _pad2d(w3, h2p, outp).astype(weight_dtype)

    b1p = _pad2d(b1.reshape(1, -1).astype(jnp.float32), 1, width)
    b2p = _pad2d(b2.reshape(1, -1).astype(jnp.float32), 1, width)
    b3p = jnp.full((1, width), _NEG_FILL, jnp.float32)
    b3p = b3p.at[:, :out_dim].set(b3.reshape(1, -1).astype(jnp.float32))
    bp = jnp.concatenate([b1p, b2p, b3p], axis=0)        # (3, width) -> one DMA

    return (w1p, w2p, w3p, bp), (in_dim, h1p, h2p, outp, out_dim)


def policy_network_forward(states, packed_params, dims, *, block_batch=2048):
    """states: [B, in_dim] f32. Returns softmax probs [B, out_dim] f32."""
    w1p, w2p, w3p, bp = packed_params
    in_dim, h1p, h2p, outp, out_dim = dims
    batch = states.shape[0]

    # Large batch tile (multiple of 256 for real workloads) to amortize the
    # ~0.35 us per-grid-step overhead; clamped for tiny demo batches.
    tb = min(block_batch, _round_up(batch, 8))
    grid = (pl.cdiv(batch, tb),)

    kernel = functools.partial(_policy_mlp_kernel,
                               h1p=h1p, h2p=h2p, outp=outp, out_dim=out_dim)

    flops = 2 * batch * (in_dim * h1p + h1p * h2p + h2p * outp)
    bytes_accessed = (
        states.size * states.dtype.itemsize
        + w1p.size * w1p.dtype.itemsize
        + w2p.size * w2p.dtype.itemsize
        + w3p.size * w3p.dtype.itemsize
        + bp.size * 4
        + batch * out_dim * 4            # de-padded output writeback
    )

    return pl.pallas_call(
        kernel,
        out_shape=jax.ShapeDtypeStruct((batch, out_dim), jnp.float32),
        grid=grid,
        in_specs=[
            pl.BlockSpec((tb, in_dim), lambda i: (i, 0)),   # pipelined batch tiles
            pl.BlockSpec(w1p.shape, lambda i: (0, 0)),      # weights: fetched once,
            pl.BlockSpec(w2p.shape, lambda i: (0, 0)),      # VMEM-resident across
            pl.BlockSpec(w3p.shape, lambda i: (0, 0)),      # the whole batch grid
            pl.BlockSpec(bp.shape, lambda i: (0, 0)),       # packed biases (3, 128)
        ],
        out_specs=pl.BlockSpec((tb, out_dim), lambda i: (i, 0)),  # only real columns
        compiler_params=pltpu.CompilerParams(
            dimension_semantics=("parallel",),   # v7x: shard batch tiles over 2 TCs
            vmem_limit_bytes=32 << 20,           # raise v5e's 16 MiB default; <= v7x 64 MiB
        ),
        cost_estimate=pl.CostEstimate(
            flops=flops,
            transcendentals=batch * out_dim,
            bytes_accessed=bytes_accessed,
        ),
    )(states, w1p, w2p, w3p, bp)


def init_params(key, input_dim, hidden_dims, output_dim):
    """Deterministic PyTorch-Linear-style init (uniform +/- 1/sqrt(fan_in)).

    Weights are stored already transposed: [fan_in, fan_out]. Biases: [1, fan_out].
    """
    dims = [input_dim] + list(hidden_dims) + [output_dim]
    params = []
    for fan_in, fan_out in zip(dims[:-1], dims[1:]):
        key, kw, kb = jax.random.split(key, 3)
        bound = 1.0 / (fan_in ** 0.5)
        w = jax.random.uniform(kw, (fan_in, fan_out), jnp.float32, -bound, bound)
        b = jax.random.uniform(kb, (1, fan_out), jnp.float32, -bound, bound)
        params.append((w, b))
    return params


def _reference_forward(states, params, compute_dtype=jnp.float32):
    """Pure-JAX reference with the same matmul operand dtype as the kernel."""
    h = states
    for w, b in params[:-1]:
        h = jnp.maximum(
            jnp.dot(h.astype(compute_dtype), w.astype(compute_dtype),
                    preferred_element_type=jnp.float32) + b, 0.0)
    w, b = params[-1]
    logits = jnp.dot(h.astype(compute_dtype), w.astype(compute_dtype),
                     preferred_element_type=jnp.float32) + b
    return jax.nn.softmax(logits, axis=-1)


if __name__ == "__main__":
    # PolicyNetwork(input_shape=(4,), output_shape=(2,), hidden_layer_dims=[32, 32])
    batch, input_dim, hidden_dims, output_dim = 8, 4, (32, 32), 2

    key = jax.random.PRNGKey(0)
    key, kx = jax.random.split(key)
    states = jax.random.normal(kx, (batch, input_dim), dtype=jnp.float32)
    params = init_params(key, input_dim, hidden_dims, output_dim)

    packed, dims = prepare_params(params, weight_dtype=jnp.bfloat16)
    probs = policy_network_forward(states, packed, dims)
    probs = jax.block_until_ready(probs)

    assert probs.shape == (batch, output_dim)
    assert bool(jnp.all(jnp.isfinite(probs)))
    # Rows sum to 1 (exact divide -> only f32 rounding error remains).
    assert jnp.allclose(jnp.sum(probs, axis=-1), 1.0, atol=1e-4)

    # Tight check vs a reference using the same bf16 matmul operands.
    ref_bf16 = _reference_forward(states, params, compute_dtype=jnp.bfloat16)
    assert jnp.allclose(probs, ref_bf16, atol=2e-3, rtol=1e-2)

    # Sanity check vs the full-f32 reference (bf16 weight quantization error only).
    ref_f32 = _reference_forward(states, params, compute_dtype=jnp.float32)
    assert jnp.allclose(probs, ref_f32, atol=5e-2)

    print("KERNEL_OK")
</pallas_src>

<mosaic_0001>
module attributes {stable_mosaic.version = 11 : i64} {
  func.func @_policy_mlp_kernel(%arg0: i32, %arg1: memref<8x4xf32, #tpu.memory_space<vmem>>, %arg2: memref<4x128xbf16, #tpu.memory_space<vmem>>, %arg3: memref<128x128xbf16, #tpu.memory_space<vmem>>, %arg4: memref<128x128xbf16, #tpu.memory_space<vmem>>, %arg5: memref<3x128xf32, #tpu.memory_space<vmem>>, %arg6: memref<8x2xf32, #tpu.memory_space<vmem>>) attributes {dimension_semantics = [#tpu.dimension_semantics<parallel>], iteration_bounds = array<i64: 1>, scalar_prefetch = 0 : i64, scratch_operands = 0 : i64, tpu.core_type = #tpu.core_type<tc>, window_params = [{transform_indices = @transform_0, window_bounds = array<i64: 8, 4>}, {pipeline_mode = #tpu.pipeline_mode<synchronous>, transform_indices = @transform_1, window_bounds = array<i64: 4, 128>}, {pipeline_mode = #tpu.pipeline_mode<synchronous>, transform_indices = @transform_2, window_bounds = array<i64: 128, 128>}, {pipeline_mode = #tpu.pipeline_mode<synchronous>, transform_indices = @transform_3, window_bounds = array<i64: 128, 128>}, {pipeline_mode = #tpu.pipeline_mode<synchronous>, transform_indices = @transform_4, window_bounds = array<i64: 3, 128>}, {transform_indices = @transform_5, window_bounds = array<i64: 8, 2>}]} {
    %c0 = arith.constant 0 : index
    %c0_0 = arith.constant 0 : index
    %0 = vector.load %arg1[%c0, %c0_0] : memref<8x4xf32, #tpu.memory_space<vmem>>, vector<8x4xf32>
    %1 = arith.truncf %0 : vector<8x4xf32> to vector<8x4xbf16>
    %c0_1 = arith.constant 0 : index
    %c0_2 = arith.constant 0 : index
    %2 = vector.load %arg2[%c0_1, %c0_2] : memref<4x128xbf16, #tpu.memory_space<vmem>>, vector<4x128xbf16>
    %cst = arith.constant dense<0.000000e+00> : vector<8x128xf32>
    %3 = tpu.matmul %1, %2, %cst {dimension_numbers = #tpu.dot_dimension_numbers<[1], [0], [0], [1], [0, 0, 1, 1], [], []>} : vector<8x4xbf16>, vector<4x128xbf16>, vector<8x128xf32> -> vector<8x128xf32>
    %c0_3 = arith.constant 0 : index
    %c0_4 = arith.constant 0 : index
    %4 = vector.load %arg5[%c0_3, %c0_4] : memref<3x128xf32, #tpu.memory_space<vmem>>, vector<1x128xf32>
    %5 = vector.broadcast %4 : vector<1x128xf32> to vector<8x128xf32>
    %6 = arith.addf %3, %5 : vector<8x128xf32>
    %cst_5 = arith.constant 0.000000e+00 : f32
    %7 = vector.broadcast %cst_5 : f32 to vector<8x128xf32>
    %8 = arith.maximumf %6, %7 : vector<8x128xf32>
    %9 = arith.truncf %8 : vector<8x128xf32> to vector<8x128xbf16>
    %c0_6 = arith.constant 0 : index
    %c0_7 = arith.constant 0 : index
    %10 = vector.load %arg3[%c0_6, %c0_7] : memref<128x128xbf16, #tpu.memory_space<vmem>>, vector<128x128xbf16>
    %cst_8 = arith.constant dense<0.000000e+00> : vector<8x128xf32>
    %11 = tpu.matmul %9, %10, %cst_8 {dimension_numbers = #tpu.dot_dimension_numbers<[1], [0], [0], [1], [0, 0, 1, 1], [], []>} : vector<8x128xbf16>, vector<128x128xbf16>, vector<8x128xf32> -> vector<8x128xf32>
    %c1 = arith.constant 1 : index
    %c0_9 = arith.constant 0 : index
    %12 = vector.load %arg5[%c1, %c0_9] : memref<3x128xf32, #tpu.memory_space<vmem>>, vector<1x128xf32>
    %13 = vector.broadcast %12 : vector<1x128xf32> to vector<8x128xf32>
    %14 = arith.addf %11, %13 : vector<8x128xf32>
    %cst_10 = arith.constant 0.000000e+00 : f32
    %15 = vector.broadcast %cst_10 : f32 to vector<8x128xf32>
    %16 = arith.maximumf %14, %15 : vector<8x128xf32>
    %17 = arith.truncf %16 : vector<8x128xf32> to vector<8x128xbf16>
    %c0_11 = arith.constant 0 : index
    %c0_12 = arith.constant 0 : index
    %18 = vector.load %arg4[%c0_11, %c0_12] : memref<128x128xbf16, #tpu.memory_space<vmem>>, vector<128x128xbf16>
    %cst_13 = arith.constant dense<0.000000e+00> : vector<8x128xf32>
    %19 = tpu.matmul %17, %18, %cst_13 {dimension_numbers = #tpu.dot_dimension_numbers<[1], [0], [0], [1], [0, 0, 1, 1], [], []>} : vector<8x128xbf16>, vector<128x128xbf16>, vector<8x128xf32> -> vector<8x128xf32>
    %c2 = arith.constant 2 : index
    %c0_14 = arith.constant 0 : index
    %20 = vector.load %arg5[%c2, %c0_14] : memref<3x128xf32, #tpu.memory_space<vmem>>, vector<1x128xf32>
    %21 = vector.broadcast %20 : vector<1x128xf32> to vector<8x128xf32>
    %22 = arith.addf %19, %21 : vector<8x128xf32>
    %cst_15 = arith.constant dense<0xFF800000> : vector<8xf32>
    %23 = vector.multi_reduction <maximumf>, %22, %cst_15 [1] : vector<8x128xf32> to vector<8xf32>
    %24 = vector.shape_cast %23 : vector<8xf32> to vector<8x1xf32>
    %25 = vector.broadcast %24 : vector<8x1xf32> to vector<8x128xf32>
    %26 = arith.subf %22, %25 : vector<8x128xf32>
    %27 = math.exp %26 : vector<8x128xf32>
    %cst_16 = arith.constant dense<0.000000e+00> : vector<8xf32>
    %28 = vector.multi_reduction <add>, %27, %cst_16 [1] : vector<8x128xf32> to vector<8xf32>
    %29 = vector.shape_cast %28 : vector<8xf32> to vector<8x1xf32>
    %cst_17 = arith.constant 1.000000e+00 : f32
    %30 = vector.broadcast %cst_17 : f32 to vector<8x1xf32>
    %31 = arith.divf %30, %29 : vector<8x1xf32>
    %32 = vector.extract_strided_slice %27 {offsets = [0, 0], sizes = [8, 2], strides = [1, 1]} : vector<8x128xf32> to vector<8x2xf32>
    %33 = vector.broadcast %31 : vector<8x1xf32> to vector<8x2xf32>
    %34 = arith.mulf %32, %33 : vector<8x2xf32>
    %c0_18 = arith.constant 0 : index
    %c0_19 = arith.constant 0 : index
    %35 = vector.load %arg6[%c0_18, %c0_19] : memref<8x2xf32, #tpu.memory_space<vmem>>, vector<8x2xf32>
    tpu.vector_store %arg6[%c0_18, %c0_19], %34 {strides = array<i32>} : memref<8x2xf32, #tpu.memory_space<vmem>>, vector<8x2xf32>,
    return
  }
  func.func @transform_0(%arg0: i32) -> (i32, i32) {
    %c0_i32 = arith.constant 0 : i32
    %c0_i32_0 = arith.constant 0 : i32
    return %arg0, %c0_i32 : i32, i32
  }
  func.func @transform_1(%arg0: i32) -> (i32, i32) {
    %c0_i32 = arith.constant 0 : i32
    %c0_i32_0 = arith.constant 0 : i32
    %c0_i32_1 = arith.constant 0 : i32
    return %c0_i32, %c0_i32_0 : i32, i32
  }
  func.func @transform_2(%arg0: i32) -> (i32, i32) {
    %c0_i32 = arith.constant 0 : i32
    %c0_i32_0 = arith.constant 0 : i32
    %c0_i32_1 = arith.constant 0 : i32
    return %c0_i32, %c0_i32_0 : i32, i32
  }
  func.func @transform_3(%arg0: i32) -> (i32, i32) {
    %c0_i32 = arith.constant 0 : i32
    %c0_i32_0 = arith.constant 0 : i32
    %c0_i32_1 = arith.constant 0 : i32
    return %c0_i32, %c0_i32_0 : i32, i32
  }
  func.func @transform_4(%arg0: i32) -> (i32, i32) {
    %c0_i32 = arith.constant 0 : i32
    %c0_i32_0 = arith.constant 0 : i32
    %c0_i32_1 = arith.constant 0 : i32
    return %c0_i32, %c0_i32_0 : i32, i32
  }
  func.func @transform_5(%arg0: i32) -> (i32, i32) {
    %c0_i32 = arith.constant 0 : i32
    %c0_i32_0 = arith.constant 0 : i32
    return %arg0, %c0_i32 : i32, i32
  }
}

</mosaic_0001>

<bundles_post_ra>
// kernel: tpu_custom_call.1
= control target key start
LH: loop header
LB: loop body
LE: loop exit
PB: predicated region body
PF: predicated region fallthrough
CT: control target
= control target key end

     0   :  { %10 = vsyncpa [#allocation3], 0  ;;  %s606_s0 = inlined_call_operand.vmem [shape: f32[8,4], index: 0, kind: input, shape index: {}]   ;;  %s607_s1 = inlined_call_operand.vmem [shape: bf16[4,128], index: 1, kind: input, shape index: {}]   ;;  %s608_s2 = inlined_call_operand.hbm [shape: bf16[128,128], index: 2, kind: input, shape index: {}]   ;;  %s609_s3 = inlined_call_operand.hbm [shape: bf16[128,128], index: 3, kind: input, shape index: {}]   ;;  %s610_s4 = inlined_call_operand.vmem [shape: f32[3,128], index: 4, kind: input, shape index: {}]   ;;  %s611_s5 = inlined_call_operand.vmem [shape: f32[8,2], index: 5, kind: output, shape index: {}]  }
   0x1   :  { %11 = vsyncpa [#allocation5], 0  ;;  %s505_s18 = smov [#allocation2]   ;;  %s457_s22 = scalar_lea.hbm %s608_s2, 1024 }
   0x2   :  { %s21_s19 = sshll.u32 %s505_s18, 4  ;;  %p458_p0 = scmp.ne.s32.totalorder %s608_s2, %s457_s22  ;;  %s22_s19 = int_to_ptr.vmem [resolvable:$true] %s21_s19 }
   0x3   :  { %p461_p1 = scmp.lt.u32.totalorder %s457_s22, %s608_s2 }
   0x5   :  { %p463_p2 = pnand %p461_p1, %p458_p0 }
   0x7   :  { %466 = shalt.err (!%p463_p2)
}
   0x8   :  { %s467_s27 = scalar_lea.vmem %s22_s19, 1024  ;;  %p472_p4 = scmp.lt.s32.totalorder %s22_s19, %s22_s19 }
   0x9   :  { %p468_p3 = scmp.ne.s32.totalorder %s22_s19, %s467_s27  ;;  %p473_p5 = scmp.lt.s32.totalorder %s467_s27, %s467_s27 }
   0xb   :  { %p474_p6 = por %p473_p5, %p472_p4 }
   0xd   :  { %p475_p7 = pnand %p474_p6, %p468_p3 }
   0xf   :  { %478 = shalt.err (!%p475_p7)
}
  0x10   :  { %s506_s28 = smov 64   ;;  %s507_s29 = smov 4  }
  0x11   :  { %27 = dma.hbm_to_vmem [thread:$0]  %s608_s2, 1024, %s22_s19, [#allocation3], %s506_s28, %s506_s28, %s507_s29  }
  0x12   :  { %s508_s7 = smov [#allocation4]   ;;  %s479_s11 = scalar_lea.hbm %s609_s3, 1024 }
  0x13   :  { %s33_s8 = sshll.u32 %s508_s7, 4  ;;  %p480_p8 = scmp.ne.s32.totalorder %s609_s3, %s479_s11  ;;  %s34_s8 = int_to_ptr.vmem [resolvable:$true] %s33_s8 }
  0x14   :  { %p483_p9 = scmp.lt.u32.totalorder %s479_s11, %s609_s3 }
  0x16   :  { %p485_p10 = pnand %p483_p9, %p480_p8 }
  0x18   :  { %488 = shalt.err (!%p485_p10)
}
  0x19   :  { %s489_s16 = scalar_lea.vmem %s34_s8, 1024  ;;  %p494_p12 = scmp.lt.s32.totalorder %s34_s8, %s34_s8 }
  0x1a   :  { %p490_p11 = scmp.ne.s32.totalorder %s34_s8, %s489_s16  ;;  %p495_p13 = scmp.lt.s32.totalorder %s489_s16, %s489_s16 }
  0x1c   :  { %p496_p0 = por %p495_p13, %p494_p12 }
  0x1e   :  { %p497_p1 = pnand %p496_p0, %p490_p11 }
  0x20   :  { %500 = shalt.err (!%p497_p1)
}
  0x21   :  { %39 = dma.hbm_to_vmem [thread:$0]  %s609_s3, 1024, %s34_s8, [#allocation5], %s506_s28, %s506_s28, %s507_s29  }
  0x22   :  { %501 = dma.done.wait [#allocation3], 1024  }
  0x23   :  { %502 = vsyncadd [#allocation3], 4294966272 }
  0x24   :  { %503 = dma.done.wait [#allocation5], 1024  }
  0x25   :  { %504 = vsyncadd [#allocation5], 4294966272  ;;  %v509_v0 = vmov 0.0   ;;  %vm510_vm0 = vmmov 0   ;;  %vm61_vm1 = vcmask 1041408   ;;  %v49_v2 = vld [vmem:[%s606_s0] sm:$0xff] }
  0x26   :  { %385 = vmatprep.subr.bf16.mxu0 %v509_v0  ;;  %387 = vmatprep.mubr.msk.bf16.mxu0 %vm510_vm0, %v509_v0  ;;  %v51_v1 = vld [vmem:[%s607_s1] sm:$0x3]  ;;  %v50_v4 = vpack.c.bf16 %v49_v2, %v49_v2  ;;  %vm57_vm2 = vcmask 31744   ;;  %v438_v6 = vld [vmem:[#allocation2 + $0x8] sm:$0xff]   ;;  %v439_v7 = vld [vmem:[#allocation2 + $0x10] sm:$0xff]   ;;  %vm337_vm3 = vcmask 15360  }
  0x27   :  { %391 = vmatprep.subr.bf16.mxu1 %v509_v0  ;;  %407 = vmatprep.mubr.msk.bf16.mxu1 %vm510_vm0, %v509_v0  ;;  %v63_v3 = vsel %vm61_vm1, %v51_v1, 0  ;;  %v437_v5 = vld [vmem:[#allocation2] sm:$0xff]   ;;  %v440_v8 = vld [vmem:[#allocation2 + $0x18] sm:$0xff]   ;;  %v442_v10 = vld [vmem:[#allocation2 + $0x28] sm:$0xff]  }
  0x28   :  { %386 = vmatpush3.bf16.msra.mxu0 %v63_v3  ;;  %392 = vmatpush3.bf16.msra.mxu1 %v437_v5  ;;  %v441_v9 = vld [vmem:[#allocation2 + $0x20] sm:$0xff]   ;;  %v443_v11 = vld [vmem:[#allocation2 + $0x30] sm:$0xff]   ;;  %v444_v12 = vld [vmem:[#allocation2 + $0x38] sm:$0xff]  }
  0x29   :  { %411 = vmatprep.subr.bf16.mxu0 %v509_v0  ;;  %393 = vmatprep.subr.bf16.mxu1 %v509_v0  ;;  %v445_v13 = vld [vmem:[#allocation4] sm:$0xff]   ;;  %v446_v14 = vld [vmem:[#allocation4 + $0x8] sm:$0xff]   ;;  %v447_v15 = vld [vmem:[#allocation4 + $0x10] sm:$0xff]  }
  0x2a   :  { %v448_v16 = vld [vmem:[#allocation4 + $0x18] sm:$0xff]   ;;  %v449_v17 = vld [vmem:[#allocation4 + $0x20] sm:$0xff]   ;;  %v450_v18 = vld [vmem:[#allocation4 + $0x28] sm:$0xff]  }
  0x2b   :  { %388 = vmatmul.mubr.msk.bf16.vlgmr.msra.gmra.mrb[0].mxu0 %vm57_vm2, %v50_v4  ;;  %v345_v19 = vld [vmem:[%s610_s4] ss:$0 sm:$0xff]  ;;  %v451_v27 = vld [vmem:[#allocation4 + $0x30] sm:$0xff]   ;;  %v452_v28 = vld [vmem:[#allocation4 + $0x38] sm:$0xff]  }
  0x2c   :  { %427 = vmatprep.mubr.msk.bf16.mxu0 %vm510_vm0, %v509_v0  ;;  %394 = vmatpush3.bf16.msra.mxu1 %v438_v6  ;;  %v347_v29 = vld [vmem:[%s610_s4 + $0x1] ss:$0 sm:$0xff]  ;;  %v356_v37 = vld [vmem:[%s610_s4 + $0x2] ss:$0 sm:$0xff] }
  0x2d   :  { %395 = vmatprep.subr.bf16.mxu1 %v509_v0  ;;  %412 = vmatpush3.bf16.msra.mxu0 %v445_v13 }
  0x2e   :  { %413 = vmatprep.subr.bf16.mxu0 %v509_v0 }
  0x30   :  { %396 = vmatpush3.bf16.msra.mxu1 %v439_v7 }
  0x31   :  { %397 = vmatprep.subr.bf16.mxu1 %v509_v0  ;;  %414 = vmatpush3.bf16.msra.mxu0 %v446_v14 }
  0x32   :  { %415 = vmatprep.subr.bf16.mxu0 %v509_v0 }
  0x34   :  { %398 = vmatpush3.bf16.msra.mxu1 %v440_v8 }
  0x35   :  { %399 = vmatprep.subr.bf16.mxu1 %v509_v0  ;;  %416 = vmatpush3.bf16.msra.mxu0 %v447_v15 }
  0x36   :  { %417 = vmatprep.subr.bf16.mxu0 %v509_v0 }
  0x38   :  { %400 = vmatpush3.bf16.msra.mxu1 %v441_v9 }
  0x39   :  { %401 = vmatprep.subr.bf16.mxu1 %v509_v0  ;;  %418 = vmatpush3.bf16.msra.mxu0 %v448_v16 }
  0x3a   :  { %419 = vmatprep.subr.bf16.mxu0 %v509_v0 }
  0x3c   :  { %402 = vmatpush3.bf16.msra.mxu1 %v442_v10 }
  0x3d   :  { %403 = vmatprep.subr.bf16.mxu1 %v509_v0  ;;  %420 = vmatpush3.bf16.msra.mxu0 %v449_v17 }
  0x3e   :  { %421 = vmatprep.subr.bf16.mxu0 %v509_v0 }
  0x40   :  { %404 = vmatpush3.bf16.msra.mxu1 %v443_v11 }
  0x41   :  { %405 = vmatprep.subr.bf16.mxu1 %v509_v0  ;;  %422 = vmatpush3.bf16.msra.mxu0 %v450_v18 }
  0x42   :  { %423 = vmatprep.subr.bf16.mxu0 %v509_v0 }
  0x44   :  { %406 = vmatpush3.bf16.msra.mxu1 %v444_v12 }
  0x45   :  { %424 = vmatpush3.bf16.msra.mxu0 %v451_v27 }
  0x46   :  { %425 = vmatprep.subr.bf16.mxu0 %v509_v0 }
  0x49   :  { %426 = vmatpush3.bf16.msra.mxu0 %v452_v28 }
  0xfe   :  { %v99_v20 = vpop.f32.mrb[0].mxu0 }
  0xff   :  { %v100_v21 = vadd.f32 %v345_v19, %v99_v20  ;;  %v389_v22 = vpop.f32.mrb[1].mxu0 }
 0x100   :  { %v102_v23 = vpop.f32.mrb[2].mxu0 }
 0x101   :  { %v105_v24 = vmax.f32 %v100_v21, 0.0  ;;  %v390_v25 = vpop.f32.mrb[3].mxu0 }
 0x103   :  { %v106_v26 = vpack.c.bf16 %v105_v24, %v105_v24 }
 0x105   :  { %408 = vmatmul.mubr.bf16.vlgmr.msra.gmra.mrb[0].mxu1 %v106_v26 }
 0x1d8   :  { %v210_v30 = vpop.f32.mrb[0].mxu1 }
 0x1d9   :  { %v211_v31 = vadd.f32 %v347_v29, %v210_v30  ;;  %v409_v32 = vpop.f32.mrb[1].mxu1 }
 0x1da   :  { %v213_v33 = vpop.f32.mrb[2].mxu1 }
 0x1db   :  { %v216_v34 = vmax.f32 %v211_v31, 0.0  ;;  %v410_v35 = vpop.f32.mrb[3].mxu1 }
 0x1dd   :  { %v217_v36 = vpack.c.bf16 %v216_v34, %v216_v34 }
 0x1df   :  { %428 = vmatmul.mubr.bf16.vlgmr.msra.gmra.mrb[4].mxu0 %v217_v36 }
 0x2b2   :  { %v321_v38 = vpop.f32.mrb[4].mxu0 }
 0x2b3   :  { %v322_v39 = vadd.f32 %v356_v37, %v321_v38  ;;  %v429_v40 = vpop.f32.mrb[5].mxu0 }
 0x2b4   :  { %v324_v41 = vpop.f32.mrb[6].mxu0 }
 0x2b5   :  { %327 = vmax.xlane.f32.xlu0 %v322_v39  ;;  %v430_v42 = vpop.f32.mrb[7].mxu0 }
 0x342   :  { %v328_v43 = vpop.xlane.xlu0 %327 }
 0x343   :  { %v329_v44 = vsub.f32 %v322_v39, %v328_v43 }
 0x345   :  { %v330_v45 = vmul.f32 1.442695, %v329_v44 }
 0x347   :  { %453 = vpow2.f32 %v330_v45 }
 0x351   :  { %v454_v46 = vpop.eup %453 }
 0x352   :  { %332 = vadd.xlane.f32.xlu0 %v454_v46 }
 0x3df   :  { %v333_v47 = vpop.xlane.xlu0 %332 }
 0x3e0   :  { %455 = vrcp.f32 %v333_v47 }
 0x3ea   :  { %v456_v48 = vpop.eup %455 }
 0x3eb   :  { %v336_v49 = vmul.f32 %v456_v48, %v454_v46 }
 0x3ed   :  { %338 = vst.msk [vmem:[%s611_s5] sm:$0xff] %vm337_vm3, %v336_v49 }
 0x3ee   :  { %343 = vsyncpa [#allocation3], 1 }
 0x3ef   :  { %344 = vsyncpa [#allocation5], 1 }

</bundles_post_ra>
